<compile_context>
chip_gen: v5e
topology: v5e:2x2
jax: 0.10.0
libtpu: 0.0.40
codegen_flags: <defaults>
</compile_context>

<pallas_src>
import jax
import jax.numpy as jnp
from jax.experimental import pallas as pl
from jax.experimental.pallas import tpu as pltpu

LANE = 128
MAX_TILE_ROWS = 256  # 256 rows x 128 lanes = 32K batch elements per grid step

IN_F = 3
HID_F = 2
OUT_F = 1


def _mlp_kernel(p_ref, x_ref, o_ref):
    # p_ref: (11,) f32 in SMEM:
    #   [w1_00, w1_01, w1_02, w1_10, w1_11, w1_12, b1_0, b1_1, w2_0, w2_1, b2_0]
    # x_ref: (3, tile_rows, 128) f32 in VMEM (batch packed sublane x lane dense)
    # o_ref: (tile_rows, 128) f32 in VMEM
    x0 = x_ref[0]
    x1 = x_ref[1]
    x2 = x_ref[2]

    # Hidden layer: h_j = relu(sum_k W1[j,k] * x_k + b1_j) -- pure VPU FMAs on
    # dense (tile_rows, 128) slabs.
    h0 = jnp.maximum(p_ref[0] * x0 + p_ref[1] * x1 + p_ref[2] * x2 + p_ref[6], 0.0)
    h1 = jnp.maximum(p_ref[3] * x0 + p_ref[4] * x1 + p_ref[5] * x2 + p_ref[7], 0.0)

    # Output layer: y = W2[0,0]*h0 + W2[0,1]*h1 + b2.
    o_ref[...] = p_ref[8] * h0 + p_ref[9] * h1 + p_ref[10]


@jax.jit
def linear_model_forward(x, w1, b1, w2, b2):
    """x: (B, 3) f32; w1: (2, 3); b1: (2,); w2: (1, 2); b2: (1,) -> (B, 1)."""
    B = x.shape[0]
    rows = -(-B // LANE)          # ceil(B / 128)
    bp = rows * LANE              # batch padded to a lane multiple (<= +127)

    # (B, 3) -> (3, rows, 128): one small pad+transpose, then a free row-major
    # reshape. Padded columns are zeros, only feed elementwise math, and are
    # sliced away at the end.
    x_fm = (
        jnp.pad(x.astype(jnp.float32), ((0, bp - B), (0, 0)))
        .T.reshape(IN_F, rows, LANE)
    )

    # Flatten the 11 parameters into one 1-D SMEM array (avoids 2-D SMEM padding).
    params = jnp.concatenate(
        [
            w1.astype(jnp.float32).reshape(-1),  # 6
            b1.astype(jnp.float32).reshape(-1),  # 2
            w2.astype(jnp.float32).reshape(-1),  # 2
            b2.astype(jnp.float32).reshape(-1),  # 1
        ]
    )

    # Tile the row (sublane-block) axis. Keep >= 2 grid steps whenever the
    # batch spans more than one 128-row so v7x's two TensorCores both get work;
    # cap at MAX_TILE_ROWS so per-step DMAs stay long but VMEM stays small.
    if rows <= 8:
        tile_rows = rows                      # single full-extent block
    else:
        half = -(-rows // 2)
        tile_rows = min(MAX_TILE_ROWS, -(-half // 8) * 8)
    grid = -(-rows // tile_rows)              # Pallas masks the ragged last block

    out = pl.pallas_call(
        _mlp_kernel,
        out_shape=jax.ShapeDtypeStruct((rows, LANE), jnp.float32),
        grid_spec=pltpu.PrefetchScalarGridSpec(
            num_scalar_prefetch=0,
            grid=(grid,),
            in_specs=[
                pl.BlockSpec(memory_space=pltpu.MemorySpace.SMEM),        # params
                pl.BlockSpec((IN_F, tile_rows, LANE), lambda i: (0, i, 0)),  # x tile
            ],
            out_specs=pl.BlockSpec((tile_rows, LANE), lambda i: (i, 0)),
        ),
        compiler_params=pltpu.CompilerParams(
            dimension_semantics=("parallel",),
        ),
    )(params, x_fm)

    # (rows, 128) -> (B, 1) via free reshapes + one small slice (no transpose).
    return out.reshape(-1)[:B].reshape(B, OUT_F)


def init_params(key):
    """Deterministic init mimicking nn.Linear (uniform +/- 1/sqrt(fan_in))."""
    k1, k2, k3, k4 = jax.random.split(key, 4)
    bound1 = 1.0 / jnp.sqrt(jnp.float32(IN_F))
    bound2 = 1.0 / jnp.sqrt(jnp.float32(HID_F))
    w1 = jax.random.uniform(k1, (HID_F, IN_F), jnp.float32, -bound1, bound1)
    b1 = jax.random.uniform(k2, (HID_F,), jnp.float32, -bound1, bound1)
    w2 = jax.random.uniform(k3, (OUT_F, HID_F), jnp.float32, -bound2, bound2)
    b2 = jax.random.uniform(k4, (OUT_F,), jnp.float32, -bound2, bound2)
    return w1, b1, w2, b2


if __name__ == "__main__":
    key = jax.random.PRNGKey(0)
    k_x, k_p = jax.random.split(key)

    batch = 8
    x = jax.random.normal(k_x, (batch, IN_F), dtype=jnp.float32)
    w1, b1, w2, b2 = init_params(k_p)

    out = jax.block_until_ready(linear_model_forward(x, w1, b1, w2, b2))
    ref = jnp.maximum(x @ w1.T + b1, 0.0) @ w2.T + b2
    assert out.shape == (batch, OUT_F), out.shape
    assert jnp.allclose(out, ref, atol=1e-5, rtol=1e-5), (out, ref)

    # Multi-tile paths: 1536 -> 12 rows (2 parallel steps, ragged 2nd block);
    # 100000 -> 782 rows (capped 256-row tiles, 4 steps, ragged last block).
    for big_b in (1536, 100_000):
        x_big = jax.random.normal(jax.random.PRNGKey(big_b), (big_b, IN_F),
                                  dtype=jnp.float32)
        out_big = jax.block_until_ready(linear_model_forward(x_big, w1, b1, w2, b2))
        ref_big = jnp.maximum(x_big @ w1.T + b1, 0.0) @ w2.T + b2
        assert out_big.shape == (big_b, OUT_F), out_big.shape
        assert jnp.allclose(out_big, ref_big, atol=1e-5, rtol=1e-5)

    print("KERNEL_OK")
</pallas_src>

<mosaic_0001>
module attributes {stable_mosaic.version = 11 : i64} {
  func.func @_mlp_kernel(%arg0: i32, %arg1: memref<11xf32, #tpu.memory_space<smem>>, %arg2: memref<3x1x128xf32, #tpu.memory_space<vmem>>, %arg3: memref<1x128xf32, #tpu.memory_space<vmem>>) attributes {dimension_semantics = [#tpu.dimension_semantics<parallel>], iteration_bounds = array<i64: 1>, scalar_prefetch = 0 : i64, scratch_operands = 0 : i64, tpu.core_type = #tpu.core_type<tc>, window_params = [{transform_indices = @transform_0, window_bounds = array<i64: 11>}, {transform_indices = @transform_1, window_bounds = array<i64: 3, 1, 128>}, {transform_indices = @transform_2, window_bounds = array<i64: 1, 128>}]} {
    %c0 = arith.constant 0 : index
    %c0_0 = arith.constant 0 : index
    %c0_1 = arith.constant 0 : index
    %0 = vector.load %arg2[%c0, %c0_0, %c0_1] : memref<3x1x128xf32, #tpu.memory_space<vmem>>, vector<1x1x128xf32>
    %1 = vector.shape_cast %0 : vector<1x1x128xf32> to vector<1x128xf32>
    %c1 = arith.constant 1 : index
    %c0_2 = arith.constant 0 : index
    %c0_3 = arith.constant 0 : index
    %2 = vector.load %arg2[%c1, %c0_2, %c0_3] : memref<3x1x128xf32, #tpu.memory_space<vmem>>, vector<1x1x128xf32>
    %3 = vector.shape_cast %2 : vector<1x1x128xf32> to vector<1x128xf32>
    %c2 = arith.constant 2 : index
    %c0_4 = arith.constant 0 : index
    %c0_5 = arith.constant 0 : index
    %4 = vector.load %arg2[%c2, %c0_4, %c0_5] : memref<3x1x128xf32, #tpu.memory_space<vmem>>, vector<1x1x128xf32>
    %5 = vector.shape_cast %4 : vector<1x1x128xf32> to vector<1x128xf32>
    %c0_6 = arith.constant 0 : index
    %6 = memref.load %arg1[%c0_6] : memref<11xf32, #tpu.memory_space<smem>>
    %7 = vector.broadcast %6 : f32 to vector<1x128xf32>
    %8 = arith.mulf %7, %1 : vector<1x128xf32>
    %c1_7 = arith.constant 1 : index
    %9 = memref.load %arg1[%c1_7] : memref<11xf32, #tpu.memory_space<smem>>
    %10 = vector.broadcast %9 : f32 to vector<1x128xf32>
    %11 = arith.mulf %10, %3 : vector<1x128xf32>
    %12 = arith.addf %8, %11 : vector<1x128xf32>
    %c2_8 = arith.constant 2 : index
    %13 = memref.load %arg1[%c2_8] : memref<11xf32, #tpu.memory_space<smem>>
    %14 = vector.broadcast %13 : f32 to vector<1x128xf32>
    %15 = arith.mulf %14, %5 : vector<1x128xf32>
    %16 = arith.addf %12, %15 : vector<1x128xf32>
    %c6 = arith.constant 6 : index
    %17 = memref.load %arg1[%c6] : memref<11xf32, #tpu.memory_space<smem>>
    %18 = vector.broadcast %17 : f32 to vector<1x128xf32>
    %19 = arith.addf %16, %18 : vector<1x128xf32>
    %cst = arith.constant 0.000000e+00 : f32
    %20 = vector.broadcast %cst : f32 to vector<1x128xf32>
    %21 = arith.maximumf %19, %20 : vector<1x128xf32>
    %c3 = arith.constant 3 : index
    %22 = memref.load %arg1[%c3] : memref<11xf32, #tpu.memory_space<smem>>
    %23 = vector.broadcast %22 : f32 to vector<1x128xf32>
    %24 = arith.mulf %23, %1 : vector<1x128xf32>
    %c4 = arith.constant 4 : index
    %25 = memref.load %arg1[%c4] : memref<11xf32, #tpu.memory_space<smem>>
    %26 = vector.broadcast %25 : f32 to vector<1x128xf32>
    %27 = arith.mulf %26, %3 : vector<1x128xf32>
    %28 = arith.addf %24, %27 : vector<1x128xf32>
    %c5 = arith.constant 5 : index
    %29 = memref.load %arg1[%c5] : memref<11xf32, #tpu.memory_space<smem>>
    %30 = vector.broadcast %29 : f32 to vector<1x128xf32>
    %31 = arith.mulf %30, %5 : vector<1x128xf32>
    %32 = arith.addf %28, %31 : vector<1x128xf32>
    %c7 = arith.constant 7 : index
    %33 = memref.load %arg1[%c7] : memref<11xf32, #tpu.memory_space<smem>>
    %34 = vector.broadcast %33 : f32 to vector<1x128xf32>
    %35 = arith.addf %32, %34 : vector<1x128xf32>
    %cst_9 = arith.constant 0.000000e+00 : f32
    %36 = vector.broadcast %cst_9 : f32 to vector<1x128xf32>
    %37 = arith.maximumf %35, %36 : vector<1x128xf32>
    %c8 = arith.constant 8 : index
    %38 = memref.load %arg1[%c8] : memref<11xf32, #tpu.memory_space<smem>>
    %39 = vector.broadcast %38 : f32 to vector<1x128xf32>
    %40 = arith.mulf %39, %21 : vector<1x128xf32>
    %c9 = arith.constant 9 : index
    %41 = memref.load %arg1[%c9] : memref<11xf32, #tpu.memory_space<smem>>
    %42 = vector.broadcast %41 : f32 to vector<1x128xf32>
    %43 = arith.mulf %42, %37 : vector<1x128xf32>
    %44 = arith.addf %40, %43 : vector<1x128xf32>
    %c10 = arith.constant 10 : index
    %45 = memref.load %arg1[%c10] : memref<11xf32, #tpu.memory_space<smem>>
    %46 = vector.broadcast %45 : f32 to vector<1x128xf32>
    %47 = arith.addf %44, %46 : vector<1x128xf32>
    %c0_10 = arith.constant 0 : index
    %c0_11 = arith.constant 0 : index
    %48 = vector.load %arg3[%c0_10, %c0_11] : memref<1x128xf32, #tpu.memory_space<vmem>>, vector<1x128xf32>
    tpu.vector_store %arg3[%c0_10, %c0_11], %47 {strides = array<i32>} : memref<1x128xf32, #tpu.memory_space<vmem>>, vector<1x128xf32>,
    return
  }
  func.func @transform_0(%arg0: i32) -> i32 {
    %c0_i32 = arith.constant 0 : i32
    %c0_i32_0 = arith.constant 0 : i32
    return %c0_i32 : i32
  }
  func.func @transform_1(%arg0: i32) -> (i32, i32, i32) {
    %c0_i32 = arith.constant 0 : i32
    %c0_i32_0 = arith.constant 0 : i32
    %c0_i32_1 = arith.constant 0 : i32
    return %c0_i32, %arg0, %c0_i32_0 : i32, i32, i32
  }
  func.func @transform_2(%arg0: i32) -> (i32, i32) {
    %c0_i32 = arith.constant 0 : i32
    %c0_i32_0 = arith.constant 0 : i32
    return %arg0, %c0_i32 : i32, i32
  }
}

</mosaic_0001>

<bundles_post_ra>
// kernel: linear_model_forward.1
= control target key start
LH: loop header
LB: loop body
LE: loop exit
PB: predicated region body
PF: predicated region fallthrough
CT: control target
= control target key end

     0   :  { %7 = vsyncpa [#allocation3], 0  ;;  %s102_s12 = smov [#allocation2]   ;;  %s133_s0 = inlined_call_operand.vmem [shape: f32[11], index: 0, kind: input, shape index: {}]   ;;  %s134_s1 = inlined_call_operand.vmem [shape: f32[3,1,128], index: 1, kind: input, shape index: {}]   ;;  %s135_s2 = inlined_call_operand.vmem [shape: f32[1,128], index: 2, kind: output, shape index: {}]  }
   0x1   :  { %s13_s11 = sshll.u32 %s133_s0, 4  ;;  %s14_s11 = int_to_ptr.vmem [resolvable:$true] %s13_s11 }
   0x2   :  { %16 = dma.vmem_to_smem %s14_s11, 16, %s102_s12, [#allocation3]  }
   0x3   :  { %100 = dma.done.wait [#allocation3], 16  }
   0x4   :  { %101 = vsyncadd [#allocation3], 4294967280 }
   0x5   :  { %23 = sfence }
   0x6   :  { %s29_s13 = sld [smem:[#allocation2]]  ;;  %v24_v0 = vld [vmem:[%s134_s1] sm:$0x1]  ;;  %v75_v1 = vld [vmem:[%s134_s1 + $0x1] sm:$0x1] }
   0x7   :  { %s77_s14 = sld [smem:[#allocation2 + $0x1]]  ;;  %v76_v2 = vld [vmem:[%s134_s1 + $0x2] sm:$0x1] }
   0x8   :  { %s78_s15 = sld [smem:[#allocation2 + $0x2]] }
   0x9   :  { %s79_s16 = sld [smem:[#allocation2 + $0x6]] }
   0xa   :  { %s80_s19 = sld [smem:[#allocation2 + $0x3]] }
   0xb   :  { %s81_s0 = sld [smem:[#allocation2 + $0x4]] }
   0xc   :  { %v30_v3 = vstv %s29_s13  ;;  %s82_s24 = sld [smem:[#allocation2 + $0x5]] }
   0xd   :  { %v31_v4 = vmul.f32 %v30_v3, %v24_v0  ;;  %v33_v5 = vstv %s77_s14  ;;  %s83_s25 = sld [smem:[#allocation2 + $0x7]] }
   0xe   :  { %v34_v6 = vmul.f32 %v75_v1, %v33_v5  ;;  %v37_v7 = vstv %s78_s15  ;;  %s84_s26 = sld [smem:[#allocation2 + $0x8]] }
   0xf   :  { %v38_v8 = vmul.f32 %v76_v2, %v37_v7  ;;  %v41_v11 = vstv %s79_s16  ;;  %s85_s27 = sld [smem:[#allocation2 + $0x9]] }
  0x10   :  { %v35_v9 = vadd.f32 %v34_v6, %v31_v4  ;;  %v45_v10 = vstv %s80_s19  ;;  %s86_s1 = sld [smem:[#allocation2 + $0xa]] }
  0x11   :  { %v46_v12 = vmul.f32 %v45_v10, %v24_v0  ;;  %v48_v13 = vstv %s81_s0 }
  0x12   :  { %v39_v14 = vadd.f32 %v38_v8, %v35_v9  ;;  %v49_v15 = vmul.f32 %v75_v1, %v48_v13  ;;  %v52_v16 = vstv %s82_s24 }
  0x13   :  { %v53_v17 = vmul.f32 %v76_v2, %v52_v16  ;;  %v56_v20 = vstv %s83_s25 }
  0x14   :  { %v42_v18 = vadd.f32 %v41_v11, %v39_v14  ;;  %v50_v19 = vadd.f32 %v49_v15, %v46_v12  ;;  %v60_v23 = vstv %s84_s26 }
  0x15   :  { %v63_v25 = vstv %s85_s27 }
  0x16   :  { %v43_v21 = vmax.f32 %v42_v18, 0.0  ;;  %v54_v22 = vadd.f32 %v53_v17, %v50_v19  ;;  %v67_v29 = vstv %s86_s1 }
  0x18   :  { %v57_v24 = vadd.f32 %v56_v20, %v54_v22  ;;  %v61_v27 = vmul.f32 %v60_v23, %v43_v21 }
  0x1a   :  { %v58_v26 = vmax.f32 %v57_v24, 0.0 }
  0x1c   :  { %v64_v28 = vmul.f32 %v63_v25, %v58_v26 }
  0x1e   :  { %v65_v30 = vadd.f32 %v64_v28, %v61_v27 }
  0x20   :  { %v68_v31 = vadd.f32 %v67_v29, %v65_v30 }
  0x22   :  { %69 = vst [vmem:[%s135_s2] sm:$0x1] %v68_v31 }
  0x23   :  { %74 = vsyncpa [#allocation3], 1 }

</bundles_post_ra>
